<compile_context>
chip_gen: v7x
topology: tpu7x:2x2x1
jax: 0.10.0
libtpu: 0.0.40
codegen_flags: <defaults>
</compile_context>

<pallas_src>
import jax
import jax.numpy as jnp
import numpy as np
from jax import lax
from jax.experimental import pallas as pl
from jax.experimental.pallas import tpu as pltpu


def _make_pointconv_kernel(bn, cin, use_vpu_fma):
    def kernel(x_ref, w_ref, o_ref):
        # x_ref: (Bn, Cin, T)   Bn batch images, one lane-dense spatial tile
        # w_ref: (Cout, Cin)    resident (trace-time sliced) weight
        # o_ref: (Bn, Cout, T)
        if use_vpu_fma:
            # Tiny Cin AND tiny accumulator: outer-product broadcast FMAs on the VPU.
            w = w_ref[...].astype(jnp.float32)          # (Cout, Cin)
            for b in range(bn):
                x = x_ref[b].astype(jnp.float32)        # (Cin, T)
                acc = w[:, 0:1] * x[0:1, :]
                for ci in range(1, cin):
                    acc = acc + w[:, ci:ci + 1] * x[ci:ci + 1, :]
                o_ref[b] = acc.astype(o_ref.dtype)
        else:
            # General path: one MXU matmul per image, native operand dtypes,
            # f32 accumulation. Memory-bound, so the matmul hides under the DMA.
            w = w_ref[...]                              # (Cout, Cin)
            for b in range(bn):
                acc = jnp.dot(w, x_ref[b], preferred_element_type=jnp.float32)
                o_ref[b] = acc.astype(o_ref.dtype)

    return kernel


def _choose_tiling(N, Cin, Cout, HW, itemsize,
                   budget_bytes=12 * 1024 * 1024, max_bn=32):
    """Pick (Bn, spatial tile) maximizing the per-step x block under a VMEM budget.

    Budget model: 2 * x_block + 2 * out_block + 2 * weight  <=  budget_bytes
    (double-buffered inputs/outputs; weight is VMEM-resident but conservatively
    counted with two buffers).
    """
    if HW < 128:
        tiles = [HW]  # full-extent lane dim is a legal block shape
    else:
        tiles = [t for t in (2048, 1024, 512, 256, 128)
                 if t <= HW and (HW % 128 != 0 or HW % t == 0)]
        if not tiles:
            tiles = [128]

    weight_bytes = 2 * Cout * Cin * itemsize
    best = (1, tiles[-1])
    best_bytes = -1
    for tile in tiles:
        for bn in range(min(N, max_bn), 0, -1):
            if N % bn:
                continue
            x_blk = bn * Cin * tile * itemsize
            o_blk = bn * Cout * tile * itemsize
            if 2 * (x_blk + o_blk) + weight_bytes > budget_bytes:
                continue
            if x_blk > best_bytes:
                best_bytes, best = x_blk, (bn, tile)
            break  # largest feasible Bn for this tile found
    return best


def dynamic_point_conv2d(x, weight, out_channel=None, stride=1):
    """Pallas forward of DynamicPointConv2d.

    x:      (N, Cin, H, W)                    NCHW, Cin <= max_in_channels
    weight: (max_out, max_in, 1, 1)           torch-style OIHW conv weight
    out_channel: active output channels (default: max_out_channels)
    """
    N, Cin, H, W = x.shape
    max_out, max_in, kh, kw = weight.shape
    assert kh == 1 and kw == 1, "pointwise conv only"
    # TODO(synk): general odd kernel_size (>1) would need halo'd spatial tiling; the
    # module's point-conv configuration is kernel_size=1, which is handled here.
    assert Cin <= max_in
    if out_channel is None:
        out_channel = max_out
    Cout = int(out_channel)

    if stride > 1:
        # 1x1 conv with padding=0 and stride s == spatial subsampling.
        # TODO(synk): fold the stride into the spatial index_map (strided pl.ds) to
        # avoid a potential extra HBM pass if XLA does not fuse this slice.
        x = x[:, :, ::stride, ::stride]
        N, Cin, H, W = x.shape

    # Dynamic channel selection == static slice at trace time.
    w2d = weight[:Cout, :Cin, 0, 0]            # (Cout, Cin)

    HW = H * W
    x2 = x.reshape(N, Cin, HW)                 # free reshape; spatial -> 128-lane axis

    itemsize = jnp.dtype(x.dtype).itemsize
    Bn, tile = _choose_tiling(N, Cin, Cout, HW, itemsize)
    grid = (N // Bn, pl.cdiv(HW, tile))

    use_vpu_fma = (Cin <= 8) and (Cout * tile <= 8192)
    kernel = _make_pointconv_kernel(Bn, Cin, use_vpu_fma)

    out2 = pl.pallas_call(
        kernel,
        out_shape=jax.ShapeDtypeStruct((N, Cout, HW), x.dtype),
        grid=grid,
        in_specs=[
            pl.BlockSpec((Bn, Cin, tile), lambda n, s: (n, 0, s)),
            pl.BlockSpec((Cout, Cin), lambda n, s: (0, 0)),   # weight stays resident
        ],
        out_specs=pl.BlockSpec((Bn, Cout, tile), lambda n, s: (n, 0, s)),
        compiler_params=pltpu.CompilerParams(
            dimension_semantics=("parallel", "parallel"),
            vmem_limit_bytes=32 * 1024 * 1024),
    )(x2, w2d)

    return out2.reshape(N, Cout, H, W)


def reference_forward(x, weight, out_channel=None, stride=1):
    """Pure-JAX reference mirroring F.conv2d with the dynamically sliced weight."""
    Cin = x.shape[1]
    if out_channel is None:
        out_channel = weight.shape[0]
    w = weight[:out_channel, :Cin, :, :]
    return lax.conv_general_dilated(
        x, w, window_strides=(stride, stride), padding="VALID",
        dimension_numbers=("NCHW", "OIHW", "NCHW"),
        precision=lax.Precision.HIGHEST)


if __name__ == "__main__":
    key = jax.random.PRNGKey(0)
    k1, k2, k3, k4 = jax.random.split(key, 4)

    # ---- Case 1: tiny channels (VPU-FMA path) + dynamic in/out channel slicing ----
    N, Cin, H, W = 2, 4, 16, 16
    max_in, max_out, out_channel = 8, 8, 6
    x = jax.random.normal(k1, (N, Cin, H, W), jnp.float32)
    weight = 0.1 * jax.random.normal(k2, (max_out, max_in, 1, 1), jnp.float32)

    out = jax.block_until_ready(dynamic_point_conv2d(x, weight, out_channel=out_channel))
    ref = jax.block_until_ready(reference_forward(x, weight, out_channel=out_channel))
    np.testing.assert_allclose(np.asarray(out), np.asarray(ref), rtol=1e-4, atol=1e-4)
    assert out.shape == (N, out_channel, H, W) and out.dtype == jnp.float32

    # ---- Case 2: larger channels (MXU matmul path), default out_channel ----
    N2, Cin2 = 2, 32
    max_in2, max_out2 = 32, 64
    x_big = jax.random.normal(k3, (N2, Cin2, H, W), jnp.float32)
    weight_big = 0.1 * jax.random.normal(k4, (max_out2, max_in2, 1, 1), jnp.float32)

    out_big = jax.block_until_ready(dynamic_point_conv2d(x_big, weight_big))
    ref_big = jax.block_until_ready(reference_forward(x_big, weight_big))
    # Slightly looser tolerance: the MXU path may round f32 operands internally.
    np.testing.assert_allclose(np.asarray(out_big), np.asarray(ref_big), rtol=5e-3, atol=5e-3)
    assert out_big.shape == (N2, max_out2, H, W) and out_big.dtype == jnp.float32

    print("KERNEL_OK")
</pallas_src>

<mosaic_0001>
module attributes {stable_mosaic.version = 11 : i64} {
  func.func @kernel(%arg0: i32, %arg1: i32, %arg2: memref<2x4x256xf32, #tpu.memory_space<vmem>>, %arg3: memref<6x4xf32, #tpu.memory_space<vmem>>, %arg4: memref<2x6x256xf32, #tpu.memory_space<vmem>>) attributes {dimension_semantics = [#tpu.dimension_semantics<parallel>, #tpu.dimension_semantics<parallel>], iteration_bounds = array<i64: 1, 1>, scalar_prefetch = 0 : i64, scratch_operands = 0 : i64, tpu.core_type = #tpu.core_type<tc>, window_params = [{transform_indices = @transform_0, window_bounds = array<i64: 2, 4, 256>}, {pipeline_mode = #tpu.pipeline_mode<synchronous>, transform_indices = @transform_1, window_bounds = array<i64: 6, 4>}, {transform_indices = @transform_2, window_bounds = array<i64: 2, 6, 256>}]} {
    %c0 = arith.constant 0 : index
    %c0_0 = arith.constant 0 : index
    %0 = vector.load %arg3[%c0, %c0_0] : memref<6x4xf32, #tpu.memory_space<vmem>>, vector<6x4xf32>
    %c0_1 = arith.constant 0 : index
    %c0_2 = arith.constant 0 : index
    %c0_3 = arith.constant 0 : index
    %1 = vector.load %arg2[%c0_1, %c0_2, %c0_3] : memref<2x4x256xf32, #tpu.memory_space<vmem>>, vector<1x4x256xf32>
    %2 = vector.shape_cast %1 : vector<1x4x256xf32> to vector<4x256xf32>
    %3 = vector.extract_strided_slice %0 {offsets = [0, 0], sizes = [6, 1], strides = [1, 1]} : vector<6x4xf32> to vector<6x1xf32>
    %4 = vector.extract_strided_slice %2 {offsets = [0, 0], sizes = [1, 256], strides = [1, 1]} : vector<4x256xf32> to vector<1x256xf32>
    %5 = vector.broadcast %3 : vector<6x1xf32> to vector<6x256xf32>
    %6 = vector.broadcast %4 : vector<1x256xf32> to vector<6x256xf32>
    %7 = arith.mulf %5, %6 : vector<6x256xf32>
    %8 = vector.extract_strided_slice %0 {offsets = [0, 1], sizes = [6, 1], strides = [1, 1]} : vector<6x4xf32> to vector<6x1xf32>
    %9 = vector.extract_strided_slice %2 {offsets = [1, 0], sizes = [1, 256], strides = [1, 1]} : vector<4x256xf32> to vector<1x256xf32>
    %10 = vector.broadcast %8 : vector<6x1xf32> to vector<6x256xf32>
    %11 = vector.broadcast %9 : vector<1x256xf32> to vector<6x256xf32>
    %12 = arith.mulf %10, %11 : vector<6x256xf32>
    %13 = arith.addf %7, %12 : vector<6x256xf32>
    %14 = vector.extract_strided_slice %0 {offsets = [0, 2], sizes = [6, 1], strides = [1, 1]} : vector<6x4xf32> to vector<6x1xf32>
    %15 = vector.extract_strided_slice %2 {offsets = [2, 0], sizes = [1, 256], strides = [1, 1]} : vector<4x256xf32> to vector<1x256xf32>
    %16 = vector.broadcast %14 : vector<6x1xf32> to vector<6x256xf32>
    %17 = vector.broadcast %15 : vector<1x256xf32> to vector<6x256xf32>
    %18 = arith.mulf %16, %17 : vector<6x256xf32>
    %19 = arith.addf %13, %18 : vector<6x256xf32>
    %20 = vector.extract_strided_slice %0 {offsets = [0, 3], sizes = [6, 1], strides = [1, 1]} : vector<6x4xf32> to vector<6x1xf32>
    %21 = vector.extract_strided_slice %2 {offsets = [3, 0], sizes = [1, 256], strides = [1, 1]} : vector<4x256xf32> to vector<1x256xf32>
    %22 = vector.broadcast %20 : vector<6x1xf32> to vector<6x256xf32>
    %23 = vector.broadcast %21 : vector<1x256xf32> to vector<6x256xf32>
    %24 = arith.mulf %22, %23 : vector<6x256xf32>
    %25 = arith.addf %19, %24 : vector<6x256xf32>
    %c0_4 = arith.constant 0 : index
    %c0_5 = arith.constant 0 : index
    %c0_6 = arith.constant 0 : index
    %26 = vector.load %arg4[%c0_4, %c0_5, %c0_6] : memref<2x6x256xf32, #tpu.memory_space<vmem>>, vector<1x6x256xf32>
    %27 = vector.shape_cast %26 : vector<1x6x256xf32> to vector<6x256xf32>
    %28 = vector.shape_cast %25 : vector<6x256xf32> to vector<1x6x256xf32>
    tpu.vector_store %arg4[%c0_4, %c0_5, %c0_6], %28 {strides = array<i32>} : memref<2x6x256xf32, #tpu.memory_space<vmem>>, vector<1x6x256xf32>,
    %c1 = arith.constant 1 : index
    %c0_7 = arith.constant 0 : index
    %c0_8 = arith.constant 0 : index
    %29 = vector.load %arg2[%c1, %c0_7, %c0_8] : memref<2x4x256xf32, #tpu.memory_space<vmem>>, vector<1x4x256xf32>
    %30 = vector.shape_cast %29 : vector<1x4x256xf32> to vector<4x256xf32>
    %31 = vector.extract_strided_slice %0 {offsets = [0, 0], sizes = [6, 1], strides = [1, 1]} : vector<6x4xf32> to vector<6x1xf32>
    %32 = vector.extract_strided_slice %30 {offsets = [0, 0], sizes = [1, 256], strides = [1, 1]} : vector<4x256xf32> to vector<1x256xf32>
    %33 = vector.broadcast %31 : vector<6x1xf32> to vector<6x256xf32>
    %34 = vector.broadcast %32 : vector<1x256xf32> to vector<6x256xf32>
    %35 = arith.mulf %33, %34 : vector<6x256xf32>
    %36 = vector.extract_strided_slice %0 {offsets = [0, 1], sizes = [6, 1], strides = [1, 1]} : vector<6x4xf32> to vector<6x1xf32>
    %37 = vector.extract_strided_slice %30 {offsets = [1, 0], sizes = [1, 256], strides = [1, 1]} : vector<4x256xf32> to vector<1x256xf32>
    %38 = vector.broadcast %36 : vector<6x1xf32> to vector<6x256xf32>
    %39 = vector.broadcast %37 : vector<1x256xf32> to vector<6x256xf32>
    %40 = arith.mulf %38, %39 : vector<6x256xf32>
    %41 = arith.addf %35, %40 : vector<6x256xf32>
    %42 = vector.extract_strided_slice %0 {offsets = [0, 2], sizes = [6, 1], strides = [1, 1]} : vector<6x4xf32> to vector<6x1xf32>
    %43 = vector.extract_strided_slice %30 {offsets = [2, 0], sizes = [1, 256], strides = [1, 1]} : vector<4x256xf32> to vector<1x256xf32>
    %44 = vector.broadcast %42 : vector<6x1xf32> to vector<6x256xf32>
    %45 = vector.broadcast %43 : vector<1x256xf32> to vector<6x256xf32>
    %46 = arith.mulf %44, %45 : vector<6x256xf32>
    %47 = arith.addf %41, %46 : vector<6x256xf32>
    %48 = vector.extract_strided_slice %0 {offsets = [0, 3], sizes = [6, 1], strides = [1, 1]} : vector<6x4xf32> to vector<6x1xf32>
    %49 = vector.extract_strided_slice %30 {offsets = [3, 0], sizes = [1, 256], strides = [1, 1]} : vector<4x256xf32> to vector<1x256xf32>
    %50 = vector.broadcast %48 : vector<6x1xf32> to vector<6x256xf32>
    %51 = vector.broadcast %49 : vector<1x256xf32> to vector<6x256xf32>
    %52 = arith.mulf %50, %51 : vector<6x256xf32>
    %53 = arith.addf %47, %52 : vector<6x256xf32>
    %c1_9 = arith.constant 1 : index
    %c0_10 = arith.constant 0 : index
    %c0_11 = arith.constant 0 : index
    %54 = vector.load %arg4[%c1_9, %c0_10, %c0_11] : memref<2x6x256xf32, #tpu.memory_space<vmem>>, vector<1x6x256xf32>
    %55 = vector.shape_cast %54 : vector<1x6x256xf32> to vector<6x256xf32>
    %56 = vector.shape_cast %53 : vector<6x256xf32> to vector<1x6x256xf32>
    tpu.vector_store %arg4[%c1_9, %c0_10, %c0_11], %56 {strides = array<i32>} : memref<2x6x256xf32, #tpu.memory_space<vmem>>, vector<1x6x256xf32>,
    return
  }
  func.func @transform_0(%arg0: i32, %arg1: i32) -> (i32, i32, i32) {
    %c0_i32 = arith.constant 0 : i32
    %c0_i32_0 = arith.constant 0 : i32
    return %arg0, %c0_i32, %arg1 : i32, i32, i32
  }
  func.func @transform_1(%arg0: i32, %arg1: i32) -> (i32, i32) {
    %c0_i32 = arith.constant 0 : i32
    %c0_i32_0 = arith.constant 0 : i32
    %c0_i32_1 = arith.constant 0 : i32
    return %c0_i32, %c0_i32_0 : i32, i32
  }
  func.func @transform_2(%arg0: i32, %arg1: i32) -> (i32, i32, i32) {
    %c0_i32 = arith.constant 0 : i32
    %c0_i32_0 = arith.constant 0 : i32
    return %arg0, %c0_i32, %arg1 : i32, i32, i32
  }
}

</mosaic_0001>

<bundles_post_ra>
// kernel: tpu_custom_call.1
= control target key start
LH: loop header
LB: loop body
LE: loop exit
PB: predicated region body
PF: predicated region fallthrough
CT: control target
= control target key end

     0   :  { %7 = vsyncpa [#allocation3], 0  ;;  %s268_s9 = smov [#allocation2]   ;;  %s317_s0 = inlined_call_operand.hbm [shape: f32[2,4,256], index: 0, kind: input, shape index: {}]   ;;  %s318_s1 = inlined_call_operand.vmem [shape: f32[6,4], index: 1, kind: input, shape index: {}]   ;;  %s319_s2 = inlined_call_operand.vmem [shape: f32[2,6,256], index: 2, kind: output, shape index: {}]  }
   0x1   :  { %s13_s10 = sshll.u32 %s268_s9, 4  ;;  %s244_s13 = scalar_lea.hbm %s317_s0, 256  ;;  %s14_s10 = int_to_ptr.vmem [resolvable:$true] %s13_s10 }
   0x2   :  { %p245_p0 = scmp.ne.s32.totalorder %s317_s0, %s244_s13  ;;  %p248_p1 = scmp.lt.u32.totalorder %s244_s13, %s317_s0 }
   0x4   :  { %p250_p2 = pnand %p248_p1, %p245_p0 }
   0x6   :  { %253 = shalt.err (!%p250_p2)
}
   0x7   :  { %s254_s18 = scalar_lea.vmem %s14_s10, 256  ;;  %p259_p4 = scmp.lt.s32.totalorder %s14_s10, %s14_s10 }
   0x8   :  { %p255_p3 = scmp.ne.s32.totalorder %s14_s10, %s254_s18  ;;  %p260_p5 = scmp.lt.s32.totalorder %s254_s18, %s254_s18 }
   0xa   :  { %p261_p6 = por %p260_p5, %p259_p4 }
   0xc   :  { %p262_p7 = pnand %p261_p6, %p255_p3 }
   0xe   :  { %265 = shalt.err (!%p262_p7)
}
   0xf   :  { %s269_s19 = smov 128   ;;  %s270_s20 = smov 8  }
  0x10   :  { %19 = dma.hbm_to_vmem [thread:$0]  %s317_s0, 256, %s14_s10, [#allocation3], %s269_s19, %s269_s19, %s270_s20  }
  0x11   :  { %266 = dma.done.wait [#allocation3], 256  }
  0x12   :  { %267 = vsyncadd [#allocation3], 4294967040  ;;  %v271_v0 = vmov 0   ;;  %v272_v1 = vmov 2   ;;  %v25_v2 = vld [vmem:[%s318_s1] sm:$0x3f]  ;;  %v33_v5 = vlaneseq }
  0x13   :  { %239 = vset.pattern.permute.xlu0 %v271_v0  ;;  %241 = vset.pattern.permute.xlu1 %v272_v1  ;;  %v273_v3 = vmov 1   ;;  %v274_v4 = vmov 3   ;;  %v26_v9 = vld [vmem:[#allocation2] sm:$0xff]  ;;  %v134_v10 = vld [vmem:[#allocation2 + $0x8] sm:$0xff] }
  0x14   :  { %29 = vperm.xlu0 %239, %v25_v2   ;;  %80 = vperm.xlu1 %241, %v25_v2   ;;  %v34_v6 = vshrl.u32 %v33_v5, 7 }
  0x16   :  { %v35_v7 = vsub.s32 0, %v34_v6  ;;  %v39_v8 = vsub.s32 4, %v34_v6  ;;  %v85_v11 = vsub.s32 2, %v34_v6  ;;  %v89_v12 = vsub.s32 6, %v34_v6 }
  0x17   :  { %v59_v13 = vsub.s32 1, %v34_v6  ;;  %v63_v14 = vsub.s32 5, %v34_v6  ;;  %v111_v15 = vsub.s32 3, %v34_v6  ;;  %v115_v16 = vsub.s32 7, %v34_v6 }
  0x18   :  { %240 = vset.pattern.permute.xlu0 %v273_v3  ;;  %242 = vset.pattern.permute.xlu1 %v274_v4  ;;  %v36_v17 = vrot.slane %v26_v9, %v35_v7  ;;  %v40_v18 = vrot.slane %v26_v9, %v39_v8  ;;  %v139_v19 = vrot.slane %v134_v10, %v35_v7 }
  0x19   :  { %54 = vperm.xlu0 %240, %v25_v2   ;;  %106 = vperm.xlu1 %242, %v25_v2   ;;  %v143_v20 = vrot.slane %v134_v10, %v39_v8  ;;  %v86_v21 = vrot.slane %v26_v9, %v85_v11  ;;  %v90_v22 = vrot.slane %v26_v9, %v89_v12 }
  0x1a   :  { %v181_v23 = vrot.slane %v134_v10, %v85_v11  ;;  %v185_v24 = vrot.slane %v134_v10, %v89_v12  ;;  %v60_v25 = vrot.slane %v26_v9, %v59_v13  ;;  %v64_v26 = vrot.slane %v26_v9, %v63_v14 }
  0x1b   :  { %v159_v27 = vrot.slane %v134_v10, %v59_v13  ;;  %v163_v28 = vrot.slane %v134_v10, %v63_v14  ;;  %v112_v29 = vrot.slane %v26_v9, %v111_v15  ;;  %v116_v30 = vrot.slane %v26_v9, %v115_v16 }
  0x1c   :  { %v203_v31 = vrot.slane %v134_v10, %v111_v15  ;;  %v207_v32 = vrot.slane %v134_v10, %v115_v16  ;;  %v46_v33 = vrot.slane %v36_v17, %v35_v7  ;;  %v50_v34 = vrot.slane %v40_v18, %v35_v7 }
  0x1d   :  { %243 = vset.pattern.permute.xlu0 %v274_v4  ;;  %v149_v35 = vrot.slane %v139_v19, %v35_v7  ;;  %v153_v36 = vrot.slane %v143_v20, %v35_v7  ;;  %v96_v39 = vrot.slane %v86_v21, %v85_v11  ;;  %v100_v40 = vrot.slane %v90_v22, %v85_v11 }
  0x1e   :  { %v191_v41 = vrot.slane %v181_v23, %v85_v11  ;;  %v195_v42 = vrot.slane %v185_v24, %v85_v11  ;;  %v70_v43 = vrot.slane %v60_v25, %v59_v13  ;;  %v74_v44 = vrot.slane %v64_v26, %v59_v13 }
  0x1f   :  { %v169_v45 = vrot.slane %v159_v27, %v59_v13  ;;  %v173_v46 = vrot.slane %v163_v28, %v59_v13  ;;  %v122_v47 = vrot.slane %v112_v29, %v111_v15  ;;  %v126_v48 = vrot.slane %v116_v30, %v111_v15 }
  0x20   :  { %v213_v49 = vrot.slane %v203_v31, %v111_v15  ;;  %v217_v50 = vrot.slane %v207_v32, %v111_v15 }
  0x93   :  { %v30_v37 = vpop.permute.xlu0 %29  ;;  %v81_v38 = vpop.permute.xlu1 %80 }
  0x94   :  { %v51_v51 = vmul.f32 %v46_v33, %v30_v37  ;;  %v52_v52 = vmul.f32 %v50_v34, %v30_v37  ;;  %v154_v53 = vmul.f32 %v149_v35, %v30_v37  ;;  %v155_v54 = vmul.f32 %v153_v36, %v30_v37 }
  0x95   :  { %v101_v55 = vmul.f32 %v96_v39, %v81_v38  ;;  %v102_v56 = vmul.f32 %v100_v40, %v81_v38  ;;  %v196_v57 = vmul.f32 %v191_v41, %v81_v38  ;;  %v197_v58 = vmul.f32 %v195_v42, %v81_v38 }
  0x98   :  { %v55_v59 = vpop.permute.xlu0 %54  ;;  %v107_v60 = vpop.permute.xlu1 %106 }
  0x99   :  { %v75_v61 = vmul.f32 %v70_v43, %v55_v59  ;;  %v76_v62 = vmul.f32 %v74_v44, %v55_v59  ;;  %v174_v63 = vmul.f32 %v169_v45, %v55_v59  ;;  %v175_v0 = vmul.f32 %v173_v46, %v55_v59 }
  0x9a   :  { %v127_v1 = vmul.f32 %v122_v47, %v107_v60  ;;  %v128_v2 = vmul.f32 %v126_v48, %v107_v60  ;;  %v218_v3 = vmul.f32 %v213_v49, %v107_v60  ;;  %v219_v4 = vmul.f32 %v217_v50, %v107_v60 }
  0x9b   :  { %v77_v5 = vadd.f32 %v75_v61, %v51_v51  ;;  %v78_v6 = vadd.f32 %v76_v62, %v52_v52  ;;  %v176_v7 = vadd.f32 %v174_v63, %v154_v53  ;;  %v177_v8 = vadd.f32 %v175_v0, %v155_v54 }
  0x9d   :  { %v103_v9 = vadd.f32 %v101_v55, %v77_v5  ;;  %v104_v10 = vadd.f32 %v102_v56, %v78_v6  ;;  %v198_v11 = vadd.f32 %v196_v57, %v176_v7  ;;  %v199_v12 = vadd.f32 %v197_v58, %v177_v8 }
  0x9f   :  { %v129_v13 = vadd.f32 %v127_v1, %v103_v9  ;;  %v130_v14 = vadd.f32 %v128_v2, %v104_v10  ;;  %v220_v15 = vadd.f32 %v218_v3, %v198_v11  ;;  %v221_v16 = vadd.f32 %v219_v4, %v199_v12 }
  0xa1   :  { %131 = vst [vmem:[%s319_s2] sm:$0x3f] %v129_v13  ;;  %132 = vst [vmem:[%s319_s2 + $0x8] sm:$0x3f] %v130_v14 }
  0xa2   :  { %230 = vst [vmem:[%s319_s2 + $0x10] sm:$0x3f] %v220_v15  ;;  %231 = vst [vmem:[%s319_s2 + $0x18] sm:$0x3f] %v221_v16 }
  0xa3   :  { %229 = vsyncpa [#allocation3], 1 }

</bundles_post_ra>
